<compile_context>
chip_gen: v7x
topology: tpu7x:2x2x1
jax: 0.10.0
libtpu: 0.0.40
codegen_flags: <defaults>
</compile_context>

<pallas_src>
import functools

import jax
import jax.numpy as jnp
from jax.experimental import pallas as pl
from jax.experimental.pallas import tpu as pltpu


def _residual_block_kernel(xp_ref, w1_ref, b1_ref, w2_ref, b2_ref, o_ref, *, th, w, c):
    # xp_ref: [1, H+2, W+2, C] padded NHWC image of this batch element (VMEM-resident)
    # w1_ref: [9*C, C] 3x3 conv weight with BN1 scale folded in (tap-major rows)
    # b1_ref: [1, C]   BN1 shift
    # w2_ref: [C, C]   1x1 conv weight with BN2 scale folded in
    # b2_ref: [1, C]   BN2 shift
    # o_ref:  [1, C, th*w]  output tile directly in NCHW layout (lane-dense last dim)
    row0 = pl.multiple_of(pl.program_id(1) * th, th)      # padded-row offset of tile
    xp = xp_ref[0, pl.ds(row0, th + 2), :, :]             # [th+2, w+2, c] halo window

    # conv3x3 (+ folded BN1): nine accumulated K=C GEMMs, im2col built in registers.
    # (Assumes W is a multiple of 8 so the (th, w, c)->(th*w, c) merge is layout-free.)
    h = jnp.zeros((th * w, c), jnp.float32)
    x_center = None
    for ky in range(3):
        for kx in range(3):
            tap = xp[ky:ky + th, kx:kx + w, :].reshape(th * w, c)
            if ky == 1 and kx == 1:
                x_center = tap                             # original rows (residual)
            t9 = ky * 3 + kx
            h = h + jnp.dot(tap, w1_ref[t9 * c:(t9 + 1) * c, :],
                            preferred_element_type=jnp.float32)
    h = jnp.maximum(h + b1_ref[...], 0.0)

    # conv1x1 (+ folded BN2), then the residual add.
    y = jnp.dot(h, w2_ref[...], preferred_element_type=jnp.float32) + b2_ref[...]
    y = y + x_center

    # Write directly in NCHW: [th*w, C] -> [C, th*w] rides the XLU; store is lane-dense.
    o_ref[0, :, :] = jnp.transpose(y).astype(o_ref.dtype)


def _choose_tile_rows(H, W, target_rows):
    """Largest divisor TH of H giving a lane-dense (multiple-of-128) TH*W tile."""
    for th in range(H, 0, -1):
        if H % th == 0 and th * W <= target_rows and (th * W) % 128 == 0:
            return th
    return H  # whole image per tile (block dim equals full dim -> always legal)


def residual_layer_forward(x_nchw, w1_oihw, w2_oihw,
                           gamma1, beta1, mean1, var1,
                           gamma2, beta2, mean2, var2, *,
                           eps=1e-5, target_tile_rows=2048):
    """ResidualLayer forward. x: [B, C, H, W] f32 -> [B, C, H, W] f32 (eval-mode BN)."""
    B, C, H, W = x_nchw.shape
    assert w1_oihw.shape[0] == C and w2_oihw.shape[:2] == (C, C), \
        "residual add requires in_channels == out_channels"

    TH = _choose_tile_rows(H, W, target_tile_rows)
    n_t = H // TH

    # ---- Fold eval-mode BatchNorm into the bias-free convs (per-channel scale+shift).
    scale1 = gamma1 / jnp.sqrt(var1 + eps)
    shift1 = beta1 - mean1 * scale1
    scale2 = gamma2 / jnp.sqrt(var2 + eps)
    shift2 = beta2 - mean2 * scale2

    # conv1 3x3: OIHW -> (ky, kx, Cin, Cout) -> [9*C, C], BN1 scale folded on Cout.
    w1_col = (jnp.transpose(w1_oihw, (2, 3, 1, 0)) * scale1[None, None, None, :]
              ).reshape(9 * C, C)
    # conv2 1x1: [Cout, Cin, 1, 1] -> [Cin, Cout], BN2 scale folded on Cout.
    w2_io = jnp.transpose(w2_oihw[:, :, 0, 0], (1, 0)) * scale2[None, :]
    b1 = shift1.reshape(1, C)
    b2 = shift2.reshape(1, C)

    # ---- Ship the activation ONCE: a single fused transpose+pad pass (no 9x im2col
    # in HBM). The kernel builds the 3x3 taps from this padded NHWC block in VMEM.
    x_pad = jnp.pad(jnp.transpose(x_nchw, (0, 2, 3, 1)),
                    ((0, 0), (1, 1), (1, 1), (0, 0)))       # [B, H+2, W+2, C]

    kernel = functools.partial(_residual_block_kernel, th=TH, w=W, c=C)

    y = pl.pallas_call(
        kernel,
        out_shape=jax.ShapeDtypeStruct((B, C, H * W), x_nchw.dtype),
        grid=(B, n_t),
        in_specs=[
            # Per-batch padded image: constant across t -> DMA'd once per batch elem.
            pl.BlockSpec((1, H + 2, W + 2, C), lambda b, t: (b, 0, 0, 0)),
            pl.BlockSpec((9 * C, C), lambda b, t: (0, 0)),   # resident weights
            pl.BlockSpec((1, C), lambda b, t: (0, 0)),
            pl.BlockSpec((C, C), lambda b, t: (0, 0)),
            pl.BlockSpec((1, C), lambda b, t: (0, 0)),
        ],
        # Lane-dense NCHW output tile: last dim TH*W is a multiple of 128 (or full).
        out_specs=pl.BlockSpec((1, C, TH * W), lambda b, t: (b, 0, t)),
        compiler_params=pltpu.CompilerParams(
            dimension_semantics=("parallel", "parallel"),
            vmem_limit_bytes=32 * 1024 * 1024,
        ),
    )(x_pad, w1_col, b1, w2_io, b2)

    return y.reshape(B, C, H, W)  # already NCHW; reshape is free (contiguous)


if __name__ == "__main__":
    # Residual add requires in_channels == out_channels; use channels = 32.
    B, C, H, W = 2, 32, 16, 16
    eps = 1e-5

    key = jax.random.PRNGKey(0)
    (k_x, k_w1, k_w2, k_g1, k_b1, k_m1, k_v1,
     k_g2, k_b2, k_m2, k_v2) = jax.random.split(key, 11)

    # PyTorch-style U(-1/sqrt(fan_in), 1/sqrt(fan_in)) conv init.
    bound1 = 1.0 / float(C * 9) ** 0.5
    bound2 = 1.0 / float(C) ** 0.5
    w1_oihw = jax.random.uniform(k_w1, (C, C, 3, 3), jnp.float32, -bound1, bound1)
    w2_oihw = jax.random.uniform(k_w2, (C, C, 1, 1), jnp.float32, -bound2, bound2)

    # Non-trivial BatchNorm parameters / running statistics.
    gamma1 = jax.random.uniform(k_g1, (C,), jnp.float32, 0.5, 1.5)
    beta1 = 0.1 * jax.random.normal(k_b1, (C,), jnp.float32)
    mean1 = 0.1 * jax.random.normal(k_m1, (C,), jnp.float32)
    var1 = jax.random.uniform(k_v1, (C,), jnp.float32, 0.5, 1.5)
    gamma2 = jax.random.uniform(k_g2, (C,), jnp.float32, 0.5, 1.5)
    beta2 = 0.1 * jax.random.normal(k_b2, (C,), jnp.float32)
    mean2 = 0.1 * jax.random.normal(k_m2, (C,), jnp.float32)
    var2 = jax.random.uniform(k_v2, (C,), jnp.float32, 0.5, 1.5)

    x = jax.random.normal(k_x, (B, C, H, W), jnp.float32)

    # ---- Pure-JAX reference: conv -> BN -> ReLU -> conv -> BN -> + x (eval-mode BN).
    dn = ("NCHW", "OIHW", "NCHW")
    hp = jax.lax.Precision.HIGHEST

    def bn(t, g, b, m, v):
        return (t - m[None, :, None, None]) * (g / jnp.sqrt(v + eps))[None, :, None, None] \
               + b[None, :, None, None]

    r = jax.lax.conv_general_dilated(x, w1_oihw, (1, 1), ((1, 1), (1, 1)),
                                     dimension_numbers=dn, precision=hp)
    r = jnp.maximum(bn(r, gamma1, beta1, mean1, var1), 0.0)
    r = jax.lax.conv_general_dilated(r, w2_oihw, (1, 1), ((0, 0), (0, 0)),
                                     dimension_numbers=dn, precision=hp)
    ref = x + bn(r, gamma2, beta2, mean2, var2)

    # Exercise both the multi-tile (halo / row-tiled grid) path and the
    # whole-image-per-tile path.
    for tile_rows in (128, 2048):
        y = residual_layer_forward(x, w1_oihw, w2_oihw,
                                   gamma1, beta1, mean1, var1,
                                   gamma2, beta2, mean2, var2,
                                   eps=eps, target_tile_rows=tile_rows)
        jax.block_until_ready(y)
        assert y.shape == ref.shape
        max_err = float(jnp.max(jnp.abs(y - ref)))
        assert jnp.allclose(y, ref, atol=1e-3, rtol=1e-3), \
            f"tile_rows={tile_rows}: max abs err = {max_err}"

    print("KERNEL_OK")
</pallas_src>

<mosaic_0001>
module attributes {stable_mosaic.version = 11 : i64} {
  func.func @_residual_block_kernel(%arg0: i32, %arg1: i32, %arg2: memref<1x18x18x32xf32, #tpu.memory_space<vmem>>, %arg3: memref<288x32xf32, #tpu.memory_space<vmem>>, %arg4: memref<1x32xf32, #tpu.memory_space<vmem>>, %arg5: memref<32x32xf32, #tpu.memory_space<vmem>>, %arg6: memref<1x32xf32, #tpu.memory_space<vmem>>, %arg7: memref<1x32x128xf32, #tpu.memory_space<vmem>>) attributes {dimension_semantics = [#tpu.dimension_semantics<parallel>, #tpu.dimension_semantics<parallel>], iteration_bounds = array<i64: 2, 2>, scalar_prefetch = 0 : i64, scratch_operands = 0 : i64, tpu.core_type = #tpu.core_type<tc>, window_params = [{transform_indices = @transform_0, window_bounds = array<i64: 1, 18, 18, 32>}, {pipeline_mode = #tpu.pipeline_mode<synchronous>, transform_indices = @transform_1, window_bounds = array<i64: 288, 32>}, {pipeline_mode = #tpu.pipeline_mode<synchronous>, transform_indices = @transform_2, window_bounds = array<i64: 1, 32>}, {pipeline_mode = #tpu.pipeline_mode<synchronous>, transform_indices = @transform_3, window_bounds = array<i64: 32, 32>}, {pipeline_mode = #tpu.pipeline_mode<synchronous>, transform_indices = @transform_4, window_bounds = array<i64: 1, 32>}, {transform_indices = @transform_5, window_bounds = array<i64: 1, 32, 128>}]} {
    %c8_i32 = arith.constant 8 : i32
    %0 = arith.muli %arg1, %c8_i32 : i32
    %1 = tpu.assume_multiple %0, 8 : i32
    %c0 = arith.constant 0 : index
    %2 = arith.index_cast %1 : i32 to index
    %c0_0 = arith.constant 0 : index
    %c0_1 = arith.constant 0 : index
    %3 = vector.load %arg2[%c0, %2, %c0_0, %c0_1] : memref<1x18x18x32xf32, #tpu.memory_space<vmem>>, vector<1x10x18x32xf32>
    %4 = vector.shape_cast %3 : vector<1x10x18x32xf32> to vector<10x18x32xf32>
    %cst = arith.constant 0.000000e+00 : f32
    %5 = vector.broadcast %cst : f32 to vector<128x32xf32>
    %6 = vector.extract_strided_slice %4 {offsets = [0, 0, 0], sizes = [8, 16, 32], strides = [1, 1, 1]} : vector<10x18x32xf32> to vector<8x16x32xf32>
    %7 = vector.shape_cast %6 : vector<8x16x32xf32> to vector<128x32xf32>
    %c0_2 = arith.constant 0 : index
    %c0_3 = arith.constant 0 : index
    %8 = vector.load %arg3[%c0_2, %c0_3] : memref<288x32xf32, #tpu.memory_space<vmem>>, vector<32x32xf32>
    %cst_4 = arith.constant dense<0.000000e+00> : vector<128x32xf32>
    %9 = tpu.matmul %7, %8, %cst_4 {dimension_numbers = #tpu.dot_dimension_numbers<[1], [0], [0], [1], [0, 0, 1, 1], [], []>} : vector<128x32xf32>, vector<32x32xf32>, vector<128x32xf32> -> vector<128x32xf32>
    %10 = arith.addf %5, %9 : vector<128x32xf32>
    %11 = vector.extract_strided_slice %4 {offsets = [0, 1, 0], sizes = [8, 16, 32], strides = [1, 1, 1]} : vector<10x18x32xf32> to vector<8x16x32xf32>
    %12 = vector.shape_cast %11 : vector<8x16x32xf32> to vector<128x32xf32>
    %c32 = arith.constant 32 : index
    %c0_5 = arith.constant 0 : index
    %13 = vector.load %arg3[%c32, %c0_5] : memref<288x32xf32, #tpu.memory_space<vmem>>, vector<32x32xf32>
    %cst_6 = arith.constant dense<0.000000e+00> : vector<128x32xf32>
    %14 = tpu.matmul %12, %13, %cst_6 {dimension_numbers = #tpu.dot_dimension_numbers<[1], [0], [0], [1], [0, 0, 1, 1], [], []>} : vector<128x32xf32>, vector<32x32xf32>, vector<128x32xf32> -> vector<128x32xf32>
    %15 = arith.addf %10, %14 : vector<128x32xf32>
    %16 = vector.extract_strided_slice %4 {offsets = [0, 2, 0], sizes = [8, 16, 32], strides = [1, 1, 1]} : vector<10x18x32xf32> to vector<8x16x32xf32>
    %17 = vector.shape_cast %16 : vector<8x16x32xf32> to vector<128x32xf32>
    %c64 = arith.constant 64 : index
    %c0_7 = arith.constant 0 : index
    %18 = vector.load %arg3[%c64, %c0_7] : memref<288x32xf32, #tpu.memory_space<vmem>>, vector<32x32xf32>
    %cst_8 = arith.constant dense<0.000000e+00> : vector<128x32xf32>
    %19 = tpu.matmul %17, %18, %cst_8 {dimension_numbers = #tpu.dot_dimension_numbers<[1], [0], [0], [1], [0, 0, 1, 1], [], []>} : vector<128x32xf32>, vector<32x32xf32>, vector<128x32xf32> -> vector<128x32xf32>
    %20 = arith.addf %15, %19 : vector<128x32xf32>
    %21 = vector.extract_strided_slice %4 {offsets = [1, 0, 0], sizes = [8, 16, 32], strides = [1, 1, 1]} : vector<10x18x32xf32> to vector<8x16x32xf32>
    %22 = vector.shape_cast %21 : vector<8x16x32xf32> to vector<128x32xf32>
    %c96 = arith.constant 96 : index
    %c0_9 = arith.constant 0 : index
    %23 = vector.load %arg3[%c96, %c0_9] : memref<288x32xf32, #tpu.memory_space<vmem>>, vector<32x32xf32>
    %cst_10 = arith.constant dense<0.000000e+00> : vector<128x32xf32>
    %24 = tpu.matmul %22, %23, %cst_10 {dimension_numbers = #tpu.dot_dimension_numbers<[1], [0], [0], [1], [0, 0, 1, 1], [], []>} : vector<128x32xf32>, vector<32x32xf32>, vector<128x32xf32> -> vector<128x32xf32>
    %25 = arith.addf %20, %24 : vector<128x32xf32>
    %26 = vector.extract_strided_slice %4 {offsets = [1, 1, 0], sizes = [8, 16, 32], strides = [1, 1, 1]} : vector<10x18x32xf32> to vector<8x16x32xf32>
    %27 = vector.shape_cast %26 : vector<8x16x32xf32> to vector<128x32xf32>
    %c128 = arith.constant 128 : index
    %c0_11 = arith.constant 0 : index
    %28 = vector.load %arg3[%c128, %c0_11] : memref<288x32xf32, #tpu.memory_space<vmem>>, vector<32x32xf32>
    %cst_12 = arith.constant dense<0.000000e+00> : vector<128x32xf32>
    %29 = tpu.matmul %27, %28, %cst_12 {dimension_numbers = #tpu.dot_dimension_numbers<[1], [0], [0], [1], [0, 0, 1, 1], [], []>} : vector<128x32xf32>, vector<32x32xf32>, vector<128x32xf32> -> vector<128x32xf32>
    %30 = arith.addf %25, %29 : vector<128x32xf32>
    %31 = vector.extract_strided_slice %4 {offsets = [1, 2, 0], sizes = [8, 16, 32], strides = [1, 1, 1]} : vector<10x18x32xf32> to vector<8x16x32xf32>
    %32 = vector.shape_cast %31 : vector<8x16x32xf32> to vector<128x32xf32>
    %c160 = arith.constant 160 : index
    %c0_13 = arith.constant 0 : index
    %33 = vector.load %arg3[%c160, %c0_13] : memref<288x32xf32, #tpu.memory_space<vmem>>, vector<32x32xf32>
    %cst_14 = arith.constant dense<0.000000e+00> : vector<128x32xf32>
    %34 = tpu.matmul %32, %33, %cst_14 {dimension_numbers = #tpu.dot_dimension_numbers<[1], [0], [0], [1], [0, 0, 1, 1], [], []>} : vector<128x32xf32>, vector<32x32xf32>, vector<128x32xf32> -> vector<128x32xf32>
    %35 = arith.addf %30, %34 : vector<128x32xf32>
    %36 = vector.extract_strided_slice %4 {offsets = [2, 0, 0], sizes = [8, 16, 32], strides = [1, 1, 1]} : vector<10x18x32xf32> to vector<8x16x32xf32>
    %37 = vector.shape_cast %36 : vector<8x16x32xf32> to vector<128x32xf32>
    %c192 = arith.constant 192 : index
    %c0_15 = arith.constant 0 : index
    %38 = vector.load %arg3[%c192, %c0_15] : memref<288x32xf32, #tpu.memory_space<vmem>>, vector<32x32xf32>
    %cst_16 = arith.constant dense<0.000000e+00> : vector<128x32xf32>
    %39 = tpu.matmul %37, %38, %cst_16 {dimension_numbers = #tpu.dot_dimension_numbers<[1], [0], [0], [1], [0, 0, 1, 1], [], []>} : vector<128x32xf32>, vector<32x32xf32>, vector<128x32xf32> -> vector<128x32xf32>
    %40 = arith.addf %35, %39 : vector<128x32xf32>
    %41 = vector.extract_strided_slice %4 {offsets = [2, 1, 0], sizes = [8, 16, 32], strides = [1, 1, 1]} : vector<10x18x32xf32> to vector<8x16x32xf32>
    %42 = vector.shape_cast %41 : vector<8x16x32xf32> to vector<128x32xf32>
    %c224 = arith.constant 224 : index
    %c0_17 = arith.constant 0 : index
    %43 = vector.load %arg3[%c224, %c0_17] : memref<288x32xf32, #tpu.memory_space<vmem>>, vector<32x32xf32>
    %cst_18 = arith.constant dense<0.000000e+00> : vector<128x32xf32>
    %44 = tpu.matmul %42, %43, %cst_18 {dimension_numbers = #tpu.dot_dimension_numbers<[1], [0], [0], [1], [0, 0, 1, 1], [], []>} : vector<128x32xf32>, vector<32x32xf32>, vector<128x32xf32> -> vector<128x32xf32>
    %45 = arith.addf %40, %44 : vector<128x32xf32>
    %46 = vector.extract_strided_slice %4 {offsets = [2, 2, 0], sizes = [8, 16, 32], strides = [1, 1, 1]} : vector<10x18x32xf32> to vector<8x16x32xf32>
    %47 = vector.shape_cast %46 : vector<8x16x32xf32> to vector<128x32xf32>
    %c256 = arith.constant 256 : index
    %c0_19 = arith.constant 0 : index
    %48 = vector.load %arg3[%c256, %c0_19] : memref<288x32xf32, #tpu.memory_space<vmem>>, vector<32x32xf32>
    %cst_20 = arith.constant dense<0.000000e+00> : vector<128x32xf32>
    %49 = tpu.matmul %47, %48, %cst_20 {dimension_numbers = #tpu.dot_dimension_numbers<[1], [0], [0], [1], [0, 0, 1, 1], [], []>} : vector<128x32xf32>, vector<32x32xf32>, vector<128x32xf32> -> vector<128x32xf32>
    %50 = arith.addf %45, %49 : vector<128x32xf32>
    %c0_21 = arith.constant 0 : index
    %c0_22 = arith.constant 0 : index
    %51 = vector.load %arg4[%c0_21, %c0_22] : memref<1x32xf32, #tpu.memory_space<vmem>>, vector<1x32xf32>
    %52 = vector.broadcast %51 : vector<1x32xf32> to vector<128x32xf32>
    %53 = arith.addf %50, %52 : vector<128x32xf32>
    %cst_23 = arith.constant 0.000000e+00 : f32
    %54 = vector.broadcast %cst_23 : f32 to vector<128x32xf32>
    %55 = arith.maximumf %53, %54 : vector<128x32xf32>
    %c0_24 = arith.constant 0 : index
    %c0_25 = arith.constant 0 : index
    %56 = vector.load %arg5[%c0_24, %c0_25] : memref<32x32xf32, #tpu.memory_space<vmem>>, vector<32x32xf32>
    %cst_26 = arith.constant dense<0.000000e+00> : vector<128x32xf32>
    %57 = tpu.matmul %55, %56, %cst_26 {dimension_numbers = #tpu.dot_dimension_numbers<[1], [0], [0], [1], [0, 0, 1, 1], [], []>} : vector<128x32xf32>, vector<32x32xf32>, vector<128x32xf32> -> vector<128x32xf32>
    %c0_27 = arith.constant 0 : index
    %c0_28 = arith.constant 0 : index
    %58 = vector.load %arg6[%c0_27, %c0_28] : memref<1x32xf32, #tpu.memory_space<vmem>>, vector<1x32xf32>
    %59 = vector.broadcast %58 : vector<1x32xf32> to vector<128x32xf32>
    %60 = arith.addf %57, %59 : vector<128x32xf32>
    %61 = arith.addf %60, %27 : vector<128x32xf32>
    %62 = tpu.transpose %61, [1, 0] : vector<128x32xf32> -> vector<32x128xf32>
    %c0_29 = arith.constant 0 : index
    %c0_30 = arith.constant 0 : index
    %c0_31 = arith.constant 0 : index
    %63 = vector.load %arg7[%c0_29, %c0_30, %c0_31] : memref<1x32x128xf32, #tpu.memory_space<vmem>>, vector<1x32x128xf32>
    %64 = vector.shape_cast %63 : vector<1x32x128xf32> to vector<32x128xf32>
    %65 = vector.shape_cast %62 : vector<32x128xf32> to vector<1x32x128xf32>
    tpu.vector_store %arg7[%c0_29, %c0_30, %c0_31], %65 {strides = array<i32>} : memref<1x32x128xf32, #tpu.memory_space<vmem>>, vector<1x32x128xf32>,
    return
  }
  func.func @transform_0(%arg0: i32, %arg1: i32) -> (i32, i32, i32, i32) {
    %c0_i32 = arith.constant 0 : i32
    %c0_i32_0 = arith.constant 0 : i32
    %c0_i32_1 = arith.constant 0 : i32
    %c0_i32_2 = arith.constant 0 : i32
    return %arg0, %c0_i32, %c0_i32_0, %c0_i32_1 : i32, i32, i32, i32
  }
  func.func @transform_1(%arg0: i32, %arg1: i32) -> (i32, i32) {
    %c0_i32 = arith.constant 0 : i32
    %c0_i32_0 = arith.constant 0 : i32
    %c0_i32_1 = arith.constant 0 : i32
    return %c0_i32, %c0_i32_0 : i32, i32
  }
  func.func @transform_2(%arg0: i32, %arg1: i32) -> (i32, i32) {
    %c0_i32 = arith.constant 0 : i32
    %c0_i32_0 = arith.constant 0 : i32
    %c0_i32_1 = arith.constant 0 : i32
    return %c0_i32, %c0_i32_0 : i32, i32
  }
  func.func @transform_3(%arg0: i32, %arg1: i32) -> (i32, i32) {
    %c0_i32 = arith.constant 0 : i32
    %c0_i32_0 = arith.constant 0 : i32
    %c0_i32_1 = arith.constant 0 : i32
    return %c0_i32, %c0_i32_0 : i32, i32
  }
  func.func @transform_4(%arg0: i32, %arg1: i32) -> (i32, i32) {
    %c0_i32 = arith.constant 0 : i32
    %c0_i32_0 = arith.constant 0 : i32
    %c0_i32_1 = arith.constant 0 : i32
    return %c0_i32, %c0_i32_0 : i32, i32
  }
  func.func @transform_5(%arg0: i32, %arg1: i32) -> (i32, i32, i32) {
    %c0_i32 = arith.constant 0 : i32
    %c0_i32_0 = arith.constant 0 : i32
    return %arg0, %c0_i32, %arg1 : i32, i32, i32
  }
}

</mosaic_0001>

<bundles_post_ra>
// kernel: tpu_custom_call.1
= control target key start
LH: loop header
LB: loop body
LE: loop exit
PB: predicated region body
PF: predicated region fallthrough
CT: control target
= control target key end

     0   :  { %10 = vsyncpa [#allocation3], 0  ;;  %s4372_s0 = inlined_call_operand.vmem [shape: f32[2,18,18,32], index: 0, kind: input, shape index: {}]   ;;  %s4373_s1 = inlined_call_operand.vmem [shape: f32[288,32], index: 1, kind: input, shape index: {}]   ;;  %s4374_s2 = inlined_call_operand.vmem [shape: f32[1,32], index: 2, kind: input, shape index: {}]   ;;  %s4375_s3 = inlined_call_operand.vmem [shape: f32[32,32], index: 3, kind: input, shape index: {}]   ;;  %s4376_s4 = inlined_call_operand.vmem [shape: f32[1,32], index: 4, kind: input, shape index: {}]   ;;  %s4377_s5 = inlined_call_operand.hbm [shape: f32[2,32,256], index: 5, kind: output, shape index: {}]  }
   0x1   :  { %12 = vsyncpa [#allocation3 + $0x1], 0  ;;  %s3488_s18 = smov 0   ;;  %s3490_s19 = smov 0  }
   0x2   :  { %s3492_s20 = smov 0   ;;  %s3494_s21 = smov 0  }
   0x3   :  { %s3496_s22 = smov 0   ;;  %s3498_s23 = smov 0  }
   0x4   :  { %s3500_s24 = smov 0   ;;  %s3502_s25 = smov 0  }
   0x5 LB: > { %s2379_s26 = sadd.s32 4294967295, %s3452_s25   ;;  %s2380_s27 = sadd.s32 4294967294, %s3452_s25   ;;  %s3452_s25 = sphi %s3502_s25, %s18_s25   ;;  %s3448_s24 = sphi %s3500_s24, %s4396_s24   ;;  %s3444_s23 = sphi %s3498_s23, %s4395_s23   ;;  %s3440_s22 = sphi %s3496_s22, %s4394_s22   ;;  %s3436_s21 = sphi %s3494_s21, %s4393_s21   ;;  %s3432_s20 = sphi %s3492_s20, %s4392_s20   ;;  %s3428_s19 = sphi %s3490_s19, %s4391_s19   ;;  %s3424_s18 = sphi %s3488_s18, %s4390_s18  }
   0x6   : > { %s27_s28 = sadd.s32 1, %s3444_s23  ;;  %s30_s29 = sadd.s32 1, %s3448_s24 }
   0x7   : > { %p28_p0 = scmp.ge.s32.totalorder %s27_s28, 2  ;;  %p159_p1 = scmp.ne.s32.totalorder %s3432_s20, %s3428_s19 }
   0x8   : > { %p160_p2 = scmp.eq.s32.totalorder %s2379_s26, 3  ;;  %p165_p5 = scmp.ne.s32.totalorder %s3428_s19, %s3424_s18 }
   0x9   : > { %s4398_s28 = smov (%p28_p0, %s27_s28), 0  ;;  %s4400_s29 = smov (!%p28_p0, %s30_s29), %s3448_s24 }
   0xa   : > { %s145_s30 = ssub.s32 %s3444_s23, %s4398_s28  ;;  %p3539_p3 = por %p160_p2, %p159_p1 }
   0xb   : > { %p32_p4 = scmp.ge.s32.totalorder %s4400_s29, 2  ;;  %p166_p6 = scmp.eq.s32.totalorder %s2380_s27, 3 }
   0xc   : > { %p2383_p7 = scmp.ge.s32.totalorder %s3452_s25, 1  ;;  %p204_p9 = scmp.lt.s32.totalorder %s3452_s25, 5 }
   0xd   : > { %s4402_s29 = smov (%p32_p4, %s4400_s29), 0  ;;  %p3548_p8 = por %p166_p6, %p165_p5 }
   0xe   : > { %s144_s8 = ssub.s32 %s3448_s24, %s4402_s29  ;;  %s149_s9 = sadd.s32 1, %s3432_s20 }
   0xf   : > { %s146_s10 = sor.u32 %s145_s30, %s144_s8  ;;  %p205_p10 = pnand %p2383_p7, %p204_p9 }
  0x10   : > { %p147_p11 = scmp.eq.s32.totalorder %s146_s10, 0 }
  0x11   : > { %208 = sbr.rel (%p205_p10) target bundleno = 760 (0x2f8), region = 40 }
  0x12   : > { %s3557_s11 = scalar_select %p147_p11, %s3432_s20, %s149_s9  }
  0x18   : > { %v1129_v0 = vld [vmem:[%s4373_s1 + $0x80] sm:$0xff]  ;;  %v1130_v1 = vld [vmem:[%s4373_s1 + $0x88] sm:$0xff]  ;;  %p232_p12 = scmp.lt.s32.totalorder %s3440_s22, 1  ;;  %v1131_v5 = vld [vmem:[%s4373_s1 + $0x90] sm:$0xff]  ;;  %s2387_s27 = smul.u32 192, %s3436_s21  ;;  %vm298_vm0 = vcmask 1046528  }
  0x19   : > { %v339_v2 = vld [vmem:[%s4373_s1 + $0x20] sm:$0xff]  ;;  %v3107_v3 = vpack.c.bf16 %v1130_v1, %v1129_v0  ;;  %v340_v4 = vld [vmem:[%s4373_s1 + $0x28] sm:$0xff]  ;;  %v1132_v6 = vld [vmem:[%s4373_s1 + $0x98] sm:$0xff]  ;;  %vm343_vm1 = vcmask 261120   ;;  %vm698_vm2 = vcmask 1045504   ;;  %s229_s8 = sand.u32 1, %s3428_s19  }
  0x1a   : > { %v3075_v7 = vpack.c.bf16 %v340_v4, %v339_v2  ;;  %v3111_v8 = vpack.c.bf16 %v1132_v6, %v1131_v5  ;;  %v341_v9 = vld [vmem:[%s4373_s1 + $0x30] sm:$0xff]  ;;  %v342_v10 = vld [vmem:[%s4373_s1 + $0x38] sm:$0xff]  ;;  %s233_s16 = scalar_select %p232_p12, %s3440_s22, 1  ;;  %v1303_v11 = vld [vmem:[%s4373_s1 + $0xa0] sm:$0xff] }
  0x1b   : > { %3108 = vmatprep.subr.bf16.mxu0 %v3107_v3  ;;  %v3079_v12 = vpack.c.bf16 %v342_v10, %v341_v9  ;;  %v1304_v13 = vld [vmem:[%s4373_s1 + $0xa8] sm:$0xff]  ;;  %v270_v14 = vld [vmem:[%s4373_s1] sm:$0xff]  ;;  %v1305_v18 = vld [vmem:[%s4373_s1 + $0xb0] sm:$0xff]  ;;  %s2384_s10 = sshll.u32 %s229_s8, 5 }
  0x1c   : > { %3076 = vmatprep.subr.bf16.mxu1 %v3075_v7  ;;  %3110 = vmatpush3.bf16.msra.mxu0 %v3107_v3  ;;  %s3283_s9 = smul.u32 432, %s233_s16  ;;  %v271_v15 = vld [vmem:[%s4373_s1 + $0x8] sm:$0xff]  ;;  %v3115_v16 = vpack.c.bf16 %v1304_v13, %v1303_v11  ;;  %v1306_v19 = vld [vmem:[%s4373_s1 + $0xb8] sm:$0xff]  ;;  %v272_v23 = vld [vmem:[%s4373_s1 + $0x10] sm:$0xff]  ;;  %s231_s12 = scalar_lea.vmem [#allocation2], %s2384_s10 }
  0x1d   : > { %3078 = vmatpush3.bf16.msra.mxu1 %v3075_v7  ;;  %3112 = vmatprep.subr.bf16.mxu0 %v3111_v8  ;;  %v3083_v17 = vpack.c.bf16 %v271_v15, %v270_v14  ;;  %v273_v33 = vld [vmem:[%s4373_s1 + $0x18] sm:$0xff]  ;;  %v3119_v39 = vpack.c.bf16 %v1306_v19, %v1305_v18  ;;  %v1472_v40 = vld [vmem:[%s4373_s1 + $0xc0] sm:$0xff]  ;;  %v1473_v54 = vld [vmem:[%s4373_s1 + $0xc8] sm:$0xff] }
  0x1e   : > { %3080 = vmatprep.subr.bf16.mxu1 %v3079_v12  ;;  %s236_s26 = scalar_lea.vmem %s4372_s0, %s3283_s9  ;;  %v3087_v53 = vpack.c.bf16 %v273_v33, %v272_v23  ;;  %v739_v56 = vld [vmem:[%s4373_s1 + $0x40] sm:$0xff]  ;;  %v740_v57 = vld [vmem:[%s4373_s1 + $0x48] sm:$0xff]  ;;  %v3713_v0 = vpack.c.bf16 %v1473_v54, %v1472_v40  ;;  %s2302_s9 = sshll.u32 %s231_s12, 4  ;;  %s4313_s9 = int_to_ptr.vmem [resolvable:$true] %s2302_s9 }
  0x1f   : > { %s3601_s30 = scalar_lea.vmem %s236_s26, %s2387_s27  ;;  %v3723_v3 = vpack.c.bf16 %v740_v57, %v739_v56  ;;  %s2551_s27 = sshll.u32 %s3440_s22, 3 }
  0x20   : > { %3114 = vmatpush3.bf16.msra.mxu0 %v3111_v8  ;;  %v3610_v20 = vld [vmem:[%s3601_s30] sm:$0xff]  ;;  %v3613_v21 = vld [vmem:[%s3601_s30 + $0x8] sm:$0xff]  ;;  %v3616_v22 = vld [vmem:[%s3601_s30 + $0x18] sm:$0xff]  ;;  %s4320_s22 = scalar_lea.sflag [#allocation3], %s229_s8  ;;  %s3454_s26 = smov [#allocation2]  }
  0x21   : > { %3082 = vmatpush3.bf16.msra.mxu1 %v3079_v12  ;;  %v299_v24 = vrot.slane %v3610_v20, 1  ;;  %v300_v25 = vrot.slane %v3613_v21, 1  ;;  %v3624_v26 = vld [vmem:[%s3601_s30 + $0x20] sm:$0xff]  ;;  %v304_v27 = vrot.slane %v3616_v22, 1  ;;  %3116 = vmatprep.subr.bf16.mxu0 %v3115_v16  ;;  %v3628_v28 = vld [vmem:[%s3601_s30 + $0x10] sm:$0x3] }
  0x22   : > { %v305_v29 = vrot.slane %v3624_v26, 1  ;;  %v302_v30 = vrot.slane %v3628_v28, 1  ;;  %v3633_v31 = vld [vmem:[%s3601_s30 + $0x28] sm:$0x3]  ;;  %v3636_v32 = vld [vmem:[%s3601_s30 + $0x30] sm:$0xff]  ;;  %3084 = vmatprep.subr.bf16.mxu1 %v3083_v17  ;;  %v3644_v36 = vld [vmem:[%s3601_s30 + $0x38] sm:$0xff] }
  0x23   : > { %v301_v34 = vsel %vm298_vm0, %v299_v24, %v300_v25  ;;  %v307_v35 = vrot.slane %v3633_v31, 1  ;;  %v309_v37 = vrot.slane %v3636_v32, 1  ;;  %v3648_v38 = vld [vmem:[%s3601_s30 + $0x40] sm:$0x3]  ;;  %v310_v43 = vrot.slane %v3644_v36, 1  ;;  %v3661_v45 = vld [vmem:[%s3601_s30 + $0x48] sm:$0xff] }
  0x24   : > { %2763 = vmatprep.mubr.msk.f32.mxu1 %vm343_vm1, %v301_v34  ;;  %v3655_v41 = vsel %vm298_vm0, %v304_v27, %v305_v29  ;;  %v303_v42 = vsel %vm298_vm0, %v300_v25, %v302_v30  ;;  %v312_v44 = vrot.slane %v3648_v38, 1  ;;  %v3664_v46 = vld [vmem:[%s3601_s30 + $0x50] sm:$0xff]  ;;  %v3667_v47 = vld [vmem:[%s3601_s30 + $0x58] sm:$0x3]  ;;  %v314_v49 = vrot.slane %v3661_v45, 1  ;;  %v3678_v51 = vld [vmem:[%s3601_s30 + $0x60] sm:$0xff] }
  0x25   : > { %4382 = vst [vmem:[#allocation5_spill] sm:$0xff] %v3655_v41  ;;  %2891 = vmatprep.mubr.msk.f32.mxu0 %vm343_vm1, %v3655_v41  ;;  %2764 = vmatmul.mubr.msk.f32.vlgmr.msra.gmra.mrb[0].mxu1 %vm343_vm1, %v303_v42  ;;  %v3673_v48 = vsel %vm298_vm0, %v305_v29, %v307_v35  ;;  %v315_v50 = vrot.slane %v3664_v46, 1  ;;  %v3681_v52 = vld [vmem:[%s3601_s30 + $0x68] sm:$0xff]  ;;  %v3691_v55 = vsel %vm298_vm0, %v309_v37, %v310_v43  ;;  %v317_v59 = vrot.slane %v3667_v47, 1  ;;  %v3711_v63 = vld [vmem:[%s3601_s30 + $0x70] sm:$0x3] }
  0x26   : > { %4383 = vst [vmem:[#allocation6_spill] sm:$0xff] %v3673_v48  ;;  %2892 = vmatmul.mubr.msk.f32.vlgmr.msra.gmra.mrb[0].mxu0 %vm343_vm1, %v3673_v48  ;;  %2766 = vmatprep.mubr.msk.f32.mxu1 %vm343_vm1, %v3655_v41  ;;  %v3702_v58 = vsel %vm298_vm0, %v310_v43, %v312_v44  ;;  %v319_v61 = vrot.slane %v3678_v51, 1  ;;  %v320_v62 = vrot.slane %v3681_v52, 1  ;;  %v3718_v1 = vld [vmem:[%s3601_s30 + $0x78] sm:$0xff]  ;;  %v3721_v2 = vld [vmem:[%s3601_s30 + $0x80] sm:$0xff]  ;;  %v322_v5 = vrot.slane %v3711_v63, 1 }
  0x27   : > { %3118 = vmatpush3.bf16.msra.mxu0 %v3115_v16  ;;  %2894 = vmatprep.mubr.msk.f32.mxu0 %vm343_vm1, %v3691_v55  ;;  %v3706_v60 = vsel %vm298_vm0, %v314_v49, %v315_v50  ;;  %v3732_v4 = vsel %vm298_vm0, %v315_v50, %v317_v59  ;;  %v324_v7 = vrot.slane %v3718_v1, 1  ;;  %v325_v8 = vrot.slane %v3721_v2, 1  ;;  %v3741_v9 = vld [vmem:[%s3601_s30 + $0x88] sm:$0x3]  ;;  %v3747_v10 = vld [vmem:[%s3601_s30 + $0x90] sm:$0xff]  ;;  %v3750_v11 = vld [vmem:[%s3601_s30 + $0x98] sm:$0xff] }
  0x28   : > { %3120 = vmatprep.subr.bf16.mxu0 %v3119_v39  ;;  %3086 = vmatpush3.bf16.msra.mxu1 %v3083_v17  ;;  %v3736_v6 = vsel %vm298_vm0, %v319_v61, %v320_v62  ;;  %v3760_v12 = vsel %vm298_vm0, %v320_v62, %v322_v5  ;;  %v327_v13 = vrot.slane %v3741_v9, 1  ;;  %v329_v15 = vrot.slane %v3747_v10, 1  ;;  %v3769_v17 = vld [vmem:[%s3601_s30 + $0xa0] sm:$0x3]  ;;  %v3774_v18 = vld [vmem:[%s3601_s30 + $0xa8] sm:$0xff]  ;;  %v3777_v19 = vld [vmem:[%s3601_s30 + $0xb0] sm:$0xff] }
  0x29   : > { %2767 = vmatmul.mubr.msk.f32.gmra.mrb[2].mxu1 %vm343_vm1, %v3673_v48  ;;  %3088 = vmatprep.subr.bf16.mxu1 %v3087_v53  ;;  %v3764_v14 = vsel %vm298_vm0, %v324_v7, %v325_v8  ;;  %v330_v16 = vrot.slane %v3750_v11, 1  ;;  %v332_v24 = vrot.slane %v3769_v17, 1  ;;  %v334_v27 = vrot.slane %v3774_v18, 1  ;;  %v3795_v30 = vld [vmem:[%s3601_s30 + $0xb8] sm:$0x3]  ;;  %v3800_v33 = vld [vmem:[%s3601_s30 + $0xc0] sm:$0xff] }
  0x2a   : > { %2895 = vmatmul.mubr.msk.f32.gmra.mrb[2].mxu0 %vm343_vm1, %v3702_v58  ;;  %2769 = vmatprep.mubr.msk.f32.mxu1 %vm343_vm1, %v3691_v55  ;;  %v3786_v23 = vsel %vm298_vm0, %v325_v8, %v327_v13  ;;  %v335_v29 = vrot.slane %v3777_v19, 1  ;;  %v3803_v34 = vld [vmem:[%s3601_s30 + $0xc8] sm:$0xff]  ;;  %v337_v37 = vrot.slane %v3795_v30, 1  ;;  %v1108_v43 = vrot.slane %v3800_v33, 1  ;;  %v3825_v49 = vld [vmem:[%s3601_s30 + $0xd0] sm:$0x3] }
  0x2b   : > { %2897 = vmatprep.mubr.msk.f32.mxu0 %vm343_vm1, %v3706_v60  ;;  %3122 = vmatpush3.bf16.msra.mxu0 %v3119_v39  ;;  %v3790_v25 = vsel %vm298_vm0, %v329_v15, %v330_v16  ;;  %v3812_v35 = vsel %vm298_vm0, %v330_v16, %v332_v24  ;;  %v3816_v39 = vld [vmem:[%s3601_s30 + $0xd8] sm:$0xff]  ;;  %v269_v40 = vld [vmem:[%s3601_s30 + $0xe8] sm:$0x3]  ;;  %v1109_v44 = vrot.slane %v3803_v34, 1  ;;  %v1111_v62 = vrot.slane %v3825_v49, 1  ;;  %s3362_s16 = sshll.u32 %s3454_s26, 4  ;;  %s3363_s16 = int_to_ptr.vmem [resolvable:$false] %s3362_s16 }
  0x2c   : > { %3090 = vmatpush3.bf16.msra.mxu1 %v3087_v53  ;;  %3124 = vmatprep.subr.bf16.mxu0 %v3713_v0  ;;  %v3820_v42 = vsel %vm298_vm0, %v334_v27, %v335_v29  ;;  %v1644_v50 = vrot.slane %v3816_v39, 1  ;;  %v3829_v53 = vld [vmem:[%s3601_s30 + $0xe0] sm:$0xff]  ;;  %v1818_v56 = vrot.slane %v3816_v39, 2  ;;  %v1647_v59 = vrot.slane %v269_v40, 1  ;;  %s2299_s30 = sadd.s32 %s3436_s21, %s2551_s27  ;;  %s3358_s21 = scalar_lea.vmem %s4313_s9, 512 }
  0x2d   : > { %2770 = vmatmul.mubr.msk.f32.gmra.mrb[4].mxu1 %vm343_vm1, %v3702_v58  ;;  %3092 = vmatprep.subr.bf16.mxu1 %v3723_v3  ;;  %v1645_v54 = vrot.slane %v3829_v53, 1  ;;  %v1819_v57 = vrot.slane %v3829_v53, 2  ;;  %v3843_v61 = vsel %vm298_vm0, %v335_v29, %v337_v37  ;;  %v3850_v7 = vsel %vm298_vm0, %v1108_v43, %v1109_v44  ;;  %s2552_s13 = sshll.u32 %s2299_s30, 7  ;;  %p3359_p13 = scmp.ne.s32.totalorder %s4313_s9, %s3358_s21 }
  0x2e   : > { %2898 = vmatmul.mubr.msk.f32.gmra.mrb[4].mxu0 %vm343_vm1, %v3732_v4  ;;  %2772 = vmatprep.mubr.msk.f32.mxu1 %vm343_vm1, %v3706_v60  ;;  %v704_v8 = vrot.slane %v3616_v22, 2  ;;  %v705_v13 = vrot.slane %v3624_v26, 2  ;;  %v707_v24 = vrot.slane %v3633_v31, 2  ;;  %v3870_v27 = vsel %vm298_vm0, %v1109_v44, %v1111_v62  ;;  %v1474_v31 = vld [vmem:[%s4373_s1 + $0xd0] sm:$0xff]  ;;  %v1475_v44 = vld [vmem:[%s4373_s1 + $0xd8] sm:$0xff]  ;;  %s4318_s17 = scalar_lea.hbm %s4377_s5, %s2552_s13  ;;  %s3364_s10 = scalar_lea.vmem %s3363_s16, 1024 }
  0x2f   : > { %2900 = vmatprep.mubr.msk.f32.mxu0 %vm343_vm1, %v3736_v6  ;;  %v3847_v5 = vsel %vm298_vm0, %v1644_v50, %v1645_v54  ;;  %v3855_v15 = vsel %vm298_vm0, %v1645_v54, %v1647_v59  ;;  %v3864_v16 = vsel %vm698_vm2, %v1818_v56, %v1819_v57  ;;  %v1821_v29 = vrot.slane %v269_v40, 2  ;;  %v741_v54 = vld [vmem:[%s4373_s1 + $0x50] sm:$0xff]  ;;  %v742_v56 = vld [vmem:[%s4373_s1 + $0x58] sm:$0xff]  ;;  %p3360_p0 = pnand %p3359_p13, %p3539_p3  ;;  %p3365_p2 = scmp.lt.s32.totalorder %s4313_s9, %s3363_s16 }
  0x30   : > { %4384 = vst [vmem:[#allocation7_spill] sm:$0xff] %v3864_v16  ;;  %v3873_v37 = vsel %vm698_vm2, %v704_v8, %v705_v13  ;;  %v709_v43 = vrot.slane %v3636_v32, 2  ;;  %v710_v50 = vrot.slane %v3644_v36, 2  ;;  %v712_v59 = vrot.slane %v3648_v38, 2  ;;  %v1650_v38 = vld [vmem:[%s4373_s1 + $0xe8] sm:$0xff]  ;;  %p3366_p4 = scmp.lt.s32.totalorder %s3364_s10, %s3358_s21 }
  0x31   : > { %2773 = vmatmul.mubr.msk.f32.gmra.mrb[6].mxu1 %vm343_vm1, %v3732_v4  ;;  %v3886_v40 = vsel %vm698_vm2, %v1819_v57, %v1821_v29  ;;  %v3901_v57 = vsel %vm698_vm2, %v705_v13, %v707_v24  ;;  %v714_v8 = vrot.slane %v3661_v45, 2  ;;  %v715_v29 = vrot.slane %v3664_v46, 2  ;;  %v936_v13 = vld [vmem:[%s4373_s1 + $0x60] sm:$0xff]  ;;  %v937_v24 = vld [vmem:[%s4373_s1 + $0x68] sm:$0xff]  ;;  %p3361_p1 = pneg %p3360_p0 }
  0x32   : > { %2901 = vmatmul.mubr.msk.f32.gmra.mrb[6].mxu0 %vm343_vm1, %v3760_v12  ;;  %2775 = vmatprep.mubr.msk.f32.mxu1 %vm343_vm1, %v3736_v6  ;;  %4385 = vst [vmem:[#allocation8_spill] sm:$0xff] %v3886_v40  ;;  %v3905_v62 = vsel %vm698_vm2, %v709_v43, %v710_v50  ;;  %v3127_v48 = vpack.c.bf16 %v1475_v44, %v1474_v31  ;;  %v1649_v40 = vld [vmem:[%s4373_s1 + $0xe0] sm:$0xff]  ;;  %v717_v31 = vrot.slane %v3667_v47, 2  ;;  %p3367_p5 = por %p3366_p4, %p3365_p2 }
  0x33   : > { %2903 = vmatprep.mubr.msk.f32.mxu0 %vm343_vm1, %v3764_v14  ;;  %v3095_v41 = vpack.c.bf16 %v742_v56, %v741_v54  ;;  %v3931_v43 = vsel %vm698_vm2, %v710_v50, %v712_v59  ;;  %v3935_v44 = vsel %vm698_vm2, %v714_v8, %v715_v29  ;;  %v719_v54 = vrot.slane %v3678_v51, 2 }
  0x34   : > { %v720_v56 = vrot.slane %v3681_v52, 2  ;;  %v3940_v16 = vpack.c.bf16 %v1650_v38, %v1649_v40  ;;  %v3953_v47 = vsel %vm698_vm2, %v715_v29, %v717_v31  ;;  %v724_v40 = vrot.slane %v3718_v1, 2  ;;  %p3368_p6 = pnand %p3367_p5, %p3361_p1 }
  0x35   : > { %2776 = vmatmul.mubr.msk.f32.gmra.mrb[8].mxu1 %vm343_vm1, %v3760_v12  ;;  %v725_v59 = vrot.slane %v3721_v2, 2  ;;  %v729_v8 = vrot.slane %v3747_v10, 2  ;;  %v730_v29 = vrot.slane %v3750_v11, 2  ;;  %v732_v38 = vrot.slane %v3769_v17, 2 }
  0x36   : > { %2904 = vmatmul.mubr.msk.f32.gmra.mrb[8].mxu0 %vm343_vm1, %v3786_v23  ;;  %2778 = vmatprep.mubr.msk.f32.mxu1 %vm343_vm1, %v3764_v14  ;;  %v3957_v50 = vsel %vm698_vm2, %v719_v54, %v720_v56  ;;  %v735_v31 = vrot.slane %v3777_v19, 2  ;;  %v737_v54 = vrot.slane %v3795_v30, 2 }
  0x37   : > { %2906 = vmatprep.mubr.msk.f32.mxu0 %vm343_vm1, %v3790_v25  ;;  %v4006_v17 = vsel %vm698_vm2, %v730_v29, %v732_v38  ;;  %v702_v38 = vrot.slane %v3628_v28, 2  ;;  %v1651_v28 = vld [vmem:[%s4373_s1 + $0xf0] sm:$0xff] }
  0x38   : > { %v4023_v30 = vsel %vm698_vm2, %v735_v31, %v737_v54  ;;  %v939_v54 = vld [vmem:[%s4373_s1 + $0x78] sm:$0xff] }
  0x39   : > { %2779 = vmatmul.mubr.msk.f32.gmra.mrb[10].mxu1 %vm343_vm1, %v3786_v23 }
  0x3a   : > { %2907 = vmatmul.mubr.msk.f32.gmra.mrb[10].mxu0 %vm343_vm1, %v3812_v35  ;;  %2781 = vmatprep.mubr.msk.f32.mxu1 %vm343_vm1, %v3790_v25 }
  0x3b   : > { %2909 = vmatprep.mubr.msk.f32.mxu0 %vm343_vm1, %v3820_v42 }
  0x3d   : > { %2782 = vmatmul.mubr.msk.f32.gmra.mrb[12].mxu1 %vm343_vm1, %v3812_v35 }
  0x3e   : > { %2910 = vmatmul.mubr.msk.f32.gmra.mrb[12].mxu0 %vm343_vm1, %v3843_v61  ;;  %2784 = vmatprep.mubr.msk.f32.mxu1 %vm343_vm1, %v3820_v42 }
  0x3f   : > { %2912 = vmatprep.mubr.msk.f32.mxu0 %vm343_vm1, %v3850_v7 }
  0x41   : > { %2785 = vmatmul.mubr.msk.f32.gmra.mrb[14].mxu1 %vm343_vm1, %v3843_v61 }
  0x42   : > { %2913 = vmatmul.mubr.msk.f32.gmra.mrb[14].mxu0 %vm343_vm1, %v3870_v27  ;;  %2795 = vmatprep.mubr.msk.f32.mxu1 %vm343_vm1, %v3610_v20 }
  0x43   : > { %2923 = vmatprep.mubr.msk.f32.mxu0 %vm343_vm1, %v3873_v37 }
  0x45   : > { %2796 = vmatmul.mubr.msk.f32.vlgmr.msra.gmra.mrb[0].mxu1 %vm343_vm1, %v3613_v21 }
  0x46   : > { %2924 = vmatmul.mubr.msk.f32.vlgmr.msra.gmra.mrb[0].mxu0 %vm343_vm1, %v3901_v57  ;;  %2798 = vmatprep.mubr.msk.f32.mxu1 %vm343_vm1, %v3616_v22 }
  0x47   : > { %3126 = vmatpush3.bf16.msra.mxu0 %v3713_v0  ;;  %2926 = vmatprep.mubr.msk.f32.mxu0 %vm343_vm1, %v3905_v62  ;;  %v3944_v0 = vpack.c.bf16 %v937_v24, %v936_v13  ;;  %v3993_v13 = vsel %vm698_vm2, %v729_v8, %v730_v29  ;;  %v734_v24 = vrot.slane %v3774_v18, 2  ;;  %v700_v8 = vrot.slane %v3613_v21, 2 }
  0x48   : > { %3128 = vmatprep.subr.bf16.mxu0 %v3127_v48  ;;  %3094 = vmatpush3.bf16.msra.mxu1 %v3723_v3  ;;  %v722_v3 = vrot.slane %v3711_v63, 2  ;;  %v3976_v63 = vsel %vm698_vm2, %v724_v40, %v725_v59  ;;  %v1299_v40 = vrot.slane %v3803_v34, 2 }
  0x49   : > { %2799 = vmatmul.mubr.msk.f32.gmra.mrb[2].mxu1 %vm343_vm1, %v3624_v26  ;;  %3096 = vmatprep.subr.bf16.mxu1 %v3095_v41 }
  0x4a   : > { %2927 = vmatmul.mubr.msk.f32.gmra.mrb[2].mxu0 %vm343_vm1, %v3931_v43  ;;  %2801 = vmatprep.mubr.msk.f32.mxu1 %vm343_vm1, %v3636_v32 }
  0x4b   : > { %2929 = vmatprep.mubr.msk.f32.mxu0 %vm343_vm1, %v3935_v44  ;;  %3130 = vmatpush3.bf16.msra.mxu0 %v3127_v48  ;;  %v3972_v48 = vsel %vm698_vm2, %v720_v56, %v722_v3  ;;  %v4010_v56 = vsel %vm698_vm2, %v734_v24, %v735_v31  ;;  %v1298_v3 = vrot.slane %v3800_v33, 2  ;;  %v703_v24 = vsel %vm698_vm2, %v700_v8, %v702_v38  ;;  %v938_v31 = vld [vmem:[%s4373_s1 + $0x70] sm:$0xff] }
  0x4c   : > { %3098 = vmatpush3.bf16.msra.mxu1 %v3095_v41  ;;  %3132 = vmatprep.subr.bf16.mxu0 %v3940_v16  ;;  %v727_v41 = vrot.slane %v3741_v9, 2 }
  0x4d   : > { %2802 = vmatmul.mubr.msk.f32.gmra.mrb[4].mxu1 %vm343_vm1, %v3644_v36  ;;  %3100 = vmatprep.subr.bf16.mxu1 %v3944_v0  ;;  %v4029_v29 = vsel %vm698_vm2, %v1298_v3, %v1299_v40 }
  0x4e   : > { %2930 = vmatmul.mubr.msk.f32.gmra.mrb[4].mxu0 %vm343_vm1, %v3953_v47  ;;  %2804 = vmatprep.mubr.msk.f32.mxu1 %vm343_vm1, %v3661_v45  ;;  %v3989_v9 = vsel %vm698_vm2, %v725_v59, %v727_v41  ;;  %v1301_v59 = vrot.slane %v3825_v49, 2  ;;  %v699_v41 = vrot.slane %v3610_v20, 2  ;;  %v1652_v49 = vld [vmem:[%s4373_s1 + $0xf8] sm:$0xff] }
  0x4f   : > { %2932 = vmatprep.mubr.msk.f32.mxu0 %vm343_vm1, %v3957_v50  ;;  %v3135_v3 = vpack.c.bf16 %v1652_v49, %v1651_v28 }
  0x50   : > { %v4041_v20 = vsel %vm698_vm2, %v1299_v40, %v1301_v59  ;;  %v701_v21 = vsel %vm698_vm2, %v699_v41, %v700_v8  ;;  %v3103_v40 = vpack.c.bf16 %v939_v54, %v938_v31  ;;  %v1823_v59 = vld [vmem:[%s4373_s1 + $0x100] sm:$0xff]  ;;  %v1824_v41 = vld [vmem:[%s4373_s1 + $0x108] sm:$0xff] }
  0x51   : > { %2805 = vmatmul.mubr.msk.f32.gmra.mrb[6].mxu1 %vm343_vm1, %v3664_v46  ;;  %v3139_v8 = vpack.c.bf16 %v1824_v41, %v1823_v59 }
  0x52   : > { %2933 = vmatmul.mubr.msk.f32.gmra.mrb[6].mxu0 %vm343_vm1, %v3972_v48  ;;  %2807 = vmatprep.mubr.msk.f32.mxu1 %vm343_vm1, %v3678_v51 }
  0x53   : > { %2935 = vmatprep.mubr.msk.f32.mxu0 %vm343_vm1, %v3976_v63 }
  0x55   : > { %2808 = vmatmul.mubr.msk.f32.gmra.mrb[8].mxu1 %vm343_vm1, %v3681_v52 }
  0x56   : > { %2936 = vmatmul.mubr.msk.f32.gmra.mrb[8].mxu0 %vm343_vm1, %v3989_v9  ;;  %2810 = vmatprep.mubr.msk.f32.mxu1 %vm343_vm1, %v3718_v1 }
  0x57   : > { %2938 = vmatprep.mubr.msk.f32.mxu0 %vm343_vm1, %v3993_v13 }
  0x59   : > { %2811 = vmatmul.mubr.msk.f32.gmra.mrb[10].mxu1 %vm343_vm1, %v3721_v2 }
  0x5a   : > { %2939 = vmatmul.mubr.msk.f32.gmra.mrb[10].mxu0 %vm343_vm1, %v4006_v17  ;;  %2813 = vmatprep.mubr.msk.f32.mxu1 %vm343_vm1, %v3747_v10 }
  0x5b   : > { %2941 = vmatprep.mubr.msk.f32.mxu0 %vm343_vm1, %v4010_v56 }
  0x5d   : > { %2814 = vmatmul.mubr.msk.f32.gmra.mrb[12].mxu1 %vm343_vm1, %v3750_v11 }
  0x5e   : > { %2942 = vmatmul.mubr.msk.f32.gmra.mrb[12].mxu0 %vm343_vm1, %v4023_v30  ;;  %2816 = vmatprep.mubr.msk.f32.mxu1 %vm343_vm1, %v3774_v18 }
  0x5f   : > { %2944 = vmatprep.mubr.msk.f32.mxu0 %vm343_vm1, %v4029_v29 }
  0x61   : > { %2817 = vmatmul.mubr.msk.f32.gmra.mrb[14].mxu1 %vm343_vm1, %v3777_v19 }
  0x62   : > { %2945 = vmatmul.mubr.msk.f32.gmra.mrb[14].mxu0 %vm343_vm1, %v4041_v20  ;;  %2827 = vmatprep.mubr.msk.f32.mxu1 %vm343_vm1, %v701_v21 }
  0x63   : > { %2955 = vmatprep.mubr.msk.f32.mxu0 %vm343_vm1, %v3636_v32 }
  0x65   : > { %2828 = vmatmul.mubr.msk.f32.vlgmr.msra.gmra.mrb[0].mxu1 %vm343_vm1, %v703_v24 }
  0x66   : > { %2956 = vmatmul.mubr.msk.f32.vlgmr.msra.gmra.mrb[0].mxu0 %vm343_vm1, %v3644_v36  ;;  %2830 = vmatprep.mubr.msk.f32.mxu1 %vm343_vm1, %v3873_v37  ;;  %v1826_v37 = vld [vmem:[%s4373_s1 + $0x118] sm:$0xff] }
  0x67   : > { %3134 = vmatpush3.bf16.msra.mxu0 %v3940_v16  ;;  %2958 = vmatprep.mubr.msk.f32.mxu0 %vm343_vm1, %v3661_v45  ;;  %v1825_v16 = vld [vmem:[%s4373_s1 + $0x110] sm:$0xff] }
  0x68   : > { %3136 = vmatprep.subr.bf16.mxu0 %v3135_v3  ;;  %3102 = vmatpush3.bf16.msra.mxu1 %v3944_v0 }
  0x69   : > { %2831 = vmatmul.mubr.msk.f32.gmra.mrb[2].mxu1 %vm343_vm1, %v3901_v57  ;;  %3104 = vmatprep.subr.bf16.mxu1 %v3103_v40 }
  0x6a   : > { %2959 = vmatmul.mubr.msk.f32.gmra.mrb[2].mxu0 %vm343_vm1, %v3664_v46  ;;  %2833 = vmatprep.mubr.msk.f32.mxu1 %vm343_vm1, %v3905_v62 }
  0x6b   : > { %2961 = vmatprep.mubr.msk.f32.mxu0 %vm343_vm1, %v3678_v51  ;;  %3138 = vmatpush3.bf16.msra.mxu0 %v3135_v3 }
  0x6c   : > { %3106 = vmatpush3.bf16.msra.mxu1 %v3103_v40  ;;  %3140 = vmatprep.subr.bf16.mxu0 %v3139_v8 }
  0x6d   : > { %2834 = vmatmul.mubr.msk.f32.gmra.mrb[4].mxu1 %vm343_vm1, %v3931_v43 }
  0x6e   : > { %2962 = vmatmul.mubr.msk.f32.gmra.mrb[4].mxu0 %vm343_vm1, %v3681_v52  ;;  %2836 = vmatprep.mubr.msk.f32.mxu1 %vm343_vm1, %v3935_v44 }
  0x6f   : > { %2964 = vmatprep.mubr.msk.f32.mxu0 %vm343_vm1, %v3718_v1 }
  0x71   : > { %2837 = vmatmul.mubr.msk.f32.gmra.mrb[6].mxu1 %vm343_vm1, %v3953_v47 }
  0x72   : > { %2965 = vmatmul.mubr.msk.f32.gmra.mrb[6].mxu0 %vm343_vm1, %v3721_v2  ;;  %2839 = vmatprep.mubr.msk.f32.mxu1 %vm343_vm1, %v3957_v50 }
  0x73   : > { %2967 = vmatprep.mubr.msk.f32.mxu0 %vm343_vm1, %v3747_v10 }
  0x75   : > { %2840 = vmatmul.mubr.msk.f32.gmra.mrb[8].mxu1 %vm343_vm1, %v3972_v48 }
  0x76   : > { %2968 = vmatmul.mubr.msk.f32.gmra.mrb[8].mxu0 %vm343_vm1, %v3750_v11  ;;  %2842 = vmatprep.mubr.msk.f32.mxu1 %vm343_vm1, %v3976_v63 }
  0x77   : > { %2970 = vmatprep.mubr.msk.f32.mxu0 %vm343_vm1, %v3774_v18 }
  0x79   : > { %2843 = vmatmul.mubr.msk.f32.gmra.mrb[10].mxu1 %vm343_vm1, %v3989_v9 }
  0x7a   : > { %2971 = vmatmul.mubr.msk.f32.gmra.mrb[10].mxu0 %vm343_vm1, %v3777_v19  ;;  %2845 = vmatprep.mubr.msk.f32.mxu1 %vm343_vm1, %v3993_v13 }
  0x7b   : > { %2973 = vmatprep.mubr.msk.f32.mxu0 %vm343_vm1, %v3800_v33 }
  0x7d   : > { %2846 = vmatmul.mubr.msk.f32.gmra.mrb[12].mxu1 %vm343_vm1, %v4006_v17 }
  0x7e   : > { %2974 = vmatmul.mubr.msk.f32.gmra.mrb[12].mxu0 %vm343_vm1, %v3803_v34  ;;  %2848 = vmatprep.mubr.msk.f32.mxu1 %vm343_vm1, %v4010_v56 }
  0x7f   : > { %2976 = vmatprep.mubr.msk.f32.mxu0 %vm343_vm1, %v3816_v39  ;;  %v3143_v39 = vpack.c.bf16 %v1826_v37, %v1825_v16 }
  0x81   : > { %2849 = vmatmul.mubr.msk.f32.gmra.mrb[14].mxu1 %vm343_vm1, %v4023_v30 }
  0x82   : > { %2977 = vmatmul.mubr.msk.f32.gmra.mrb[14].mxu0 %vm343_vm1, %v3829_v53  ;;  %2859 = vmatprep.mubr.msk.f32.mxu1 %vm343_vm1, %v3616_v22  ;;  %v4386_v22 = vld [vmem:[#allocation7_spill] sm:$0xff] }
  0x83   : > { %2987 = vmatprep.mubr.msk.f32.mxu0 %vm343_vm1, %v3691_v55 }
  0x85   : > { %2860 = vmatmul.mubr.msk.f32.vlgmr.msra.gmra.mrb[0].mxu1 %vm343_vm1, %v3624_v26  ;;  %v4387_v26 = vld [vmem:[#allocation8_spill] sm:$0xff] }
  0x86   : > { %2988 = vmatmul.mubr.msk.f32.vlgmr.msra.gmra.mrb[0].mxu0 %vm343_vm1, %v3702_v58  ;;  %2862 = vmatprep.mubr.msk.f32.mxu1 %vm343_vm1, %v3636_v32  ;;  %v2031_v32 = vld [vmem:[%s4375_s3] sm:$0xff] }
  0x87   : > { %3142 = vmatpush3.bf16.msra.mxu0 %v3139_v8  ;;  %2990 = vmatprep.mubr.msk.f32.mxu0 %vm343_vm1, %v3706_v60 }
  0x88   : > { %3144 = vmatprep.subr.bf16.mxu0 %v3143_v39 }
  0x89   : > { %2863 = vmatmul.mubr.msk.f32.gmra.mrb[2].mxu1 %vm343_vm1, %v3644_v36  ;;  %v2032_v36 = vld [vmem:[%s4375_s3 + $0x8] sm:$0xff] }
  0x8a   : > { %2991 = vmatmul.mubr.msk.f32.gmra.mrb[2].mxu0 %vm343_vm1, %v3732_v4  ;;  %2865 = vmatprep.mubr.msk.f32.mxu1 %vm343_vm1, %v3661_v45  ;;  %v3147_v45 = vpack.c.bf16 %v2032_v36, %v2031_v32 }
  0x8b   : > { %2993 = vmatprep.mubr.msk.f32.mxu0 %vm343_vm1, %v3736_v6  ;;  %3146 = vmatpush3.bf16.msra.mxu0 %v3143_v39 }
  0x8c   : > { %3148 = vmatprep.subr.bf16.mxu1 %v3147_v45 }
  0x8d   : > { %2866 = vmatmul.mubr.msk.f32.gmra.mrb[4].mxu1 %vm343_vm1, %v3664_v46  ;;  %v2033_v46 = vld [vmem:[%s4375_s3 + $0x10] sm:$0xff] }
  0x8e   : > { %2994 = vmatmul.mubr.msk.f32.gmra.mrb[4].mxu0 %vm343_vm1, %v3760_v12  ;;  %2868 = vmatprep.mubr.msk.f32.mxu1 %vm343_vm1, %v3678_v51  ;;  %v2034_v51 = vld [vmem:[%s4375_s3 + $0x18] sm:$0xff] }
  0x8f   : > { %2996 = vmatprep.mubr.msk.f32.mxu0 %vm343_vm1, %v3764_v14  ;;  %3150 = vmatpush3.bf16.msra.mxu1 %v3147_v45 }
  0x91   : > { %2869 = vmatmul.mubr.msk.f32.gmra.mrb[6].mxu1 %vm343_vm1, %v3681_v52  ;;  %v3151_v52 = vpack.c.bf16 %v2034_v51, %v2033_v46 }
  0x92   : > { %2997 = vmatmul.mubr.msk.f32.gmra.mrb[6].mxu0 %vm343_vm1, %v3786_v23  ;;  %2871 = vmatprep.mubr.msk.f32.mxu1 %vm343_vm1, %v3718_v1 }
  0x93   : > { %2999 = vmatprep.mubr.msk.f32.mxu0 %vm343_vm1, %v3790_v25  ;;  %3152 = vmatprep.subr.bf16.mxu1 %v3151_v52 }
  0x94   : > { %3154 = vmatpush3.bf16.msra.mxu1 %v3151_v52 }
  0x95   : > { %2872 = vmatmul.mubr.msk.f32.gmra.mrb[8].mxu1 %vm343_vm1, %v3721_v2 }
  0x96   : > { %3000 = vmatmul.mubr.msk.f32.gmra.mrb[8].mxu0 %vm343_vm1, %v3812_v35  ;;  %2874 = vmatprep.mubr.msk.f32.mxu1 %vm343_vm1, %v3747_v10 }
  0x97   : > { %3002 = vmatprep.mubr.msk.f32.mxu0 %vm343_vm1, %v3820_v42 }
  0x99   : > { %2875 = vmatmul.mubr.msk.f32.gmra.mrb[10].mxu1 %vm343_vm1, %v3750_v11 }
  0x9a   : > { %3003 = vmatmul.mubr.msk.f32.gmra.mrb[10].mxu0 %vm343_vm1, %v3843_v61  ;;  %2877 = vmatprep.mubr.msk.f32.mxu1 %vm343_vm1, %v3774_v18 }
  0x9b   : > { %3005 = vmatprep.mubr.msk.f32.mxu0 %vm343_vm1, %v3850_v7 }
  0x9d   : > { %2878 = vmatmul.mubr.msk.f32.gmra.mrb[12].mxu1 %vm343_vm1, %v3777_v19 }
  0x9e   : > { %3006 = vmatmul.mubr.msk.f32.gmra.mrb[12].mxu0 %vm343_vm1, %v3870_v27  ;;  %2880 = vmatprep.mubr.msk.f32.mxu1 %vm343_vm1, %v3800_v33 }
  0x9f   : > { %3008 = vmatprep.mubr.msk.f32.mxu0 %vm343_vm1, %v3847_v5 }
  0xa1   : > { %2881 = vmatmul.mubr.msk.f32.gmra.mrb[14].mxu1 %vm343_vm1, %v3803_v34 }
  0xa2   : > { %3009 = vmatmul.mubr.msk.f32.gmra.mrb[14].mxu0 %vm343_vm1, %v3855_v15 }
  0xa3   : > { %3019 = vmatprep.mubr.msk.f32.mxu0 %vm343_vm1, %v3905_v62 }
  0xa6   : > { %3020 = vmatmul.mubr.msk.f32.vlgmr.msra.gmra.mrb[0].mxu0 %vm343_vm1, %v3931_v43 }
  0xa7   : > { %3022 = vmatprep.mubr.msk.f32.mxu0 %vm343_vm1, %v3935_v44 }
  0xaa   : > { %3023 = vmatmul.mubr.msk.f32.gmra.mrb[2].mxu0 %vm343_vm1, %v3953_v47 }
  0xab   : > { %3025 = vmatprep.mubr.msk.f32.mxu0 %vm343_vm1, %v3957_v50  ;;  %v4254_v50 = vld [vmem:[%s4374_s2] ss:$0 sm:$0xff] }
  0xae   : > { %3026 = vmatmul.mubr.msk.f32.gmra.mrb[4].mxu0 %vm343_vm1, %v3972_v48 }
  0xaf   : > { %3028 = vmatprep.mubr.msk.f32.mxu0 %vm343_vm1, %v3976_v63 }
  0xb2   : > { %3029 = vmatmul.mubr.msk.f32.gmra.mrb[6].mxu0 %vm343_vm1, %v3989_v9 }
  0xb3   : > { %3031 = vmatprep.mubr.msk.f32.mxu0 %vm343_vm1, %v3993_v13 }
  0xb6   : > { %3032 = vmatmul.mubr.msk.f32.gmra.mrb[8].mxu0 %vm343_vm1, %v4006_v17 }
  0xb7   : > { %3034 = vmatprep.mubr.msk.f32.mxu0 %vm343_vm1, %v4010_v56 }
  0xba   : > { %3035 = vmatmul.mubr.msk.f32.gmra.mrb[10].mxu0 %vm343_vm1, %v4023_v30 }
  0xbb   : > { %3037 = vmatprep.mubr.msk.f32.mxu0 %vm343_vm1, %v4029_v29 }
  0xbe   : > { %3038 = vmatmul.mubr.msk.f32.gmra.mrb[12].mxu0 %vm343_vm1, %v4041_v20 }
  0xbf   : > { %3040 = vmatprep.mubr.msk.f32.mxu0 %vm343_vm1, %v4386_v22 }
  0xc2   : > { %3041 = vmatmul.mubr.msk.f32.gmra.mrb[14].mxu0 %vm343_vm1, %v4387_v26 }
 0x158   : > { %v2861_v1 = vpop.f32.mrb[0].mxu1 }
 0x159   : > { %v1012_v2 = vpop.f32.mrb[1].mxu1 }
 0x15c   : > { %v2864_v10 = vpop.f32.mrb[2].mxu1 }
 0x15d   : > { %v1022_v11 = vpop.f32.mrb[3].mxu1 }
 0x160   : > { %v2867_v18 = vpop.f32.mrb[4].mxu1 }
 0x161   : > { %v1032_v19 = vpop.f32.mrb[5].mxu1 }
 0x164   : > { %v2870_v33 = vpop.f32.mrb[6].mxu1 }
 0x165   : > { %v1042_v34 = vpop.f32.mrb[7].mxu1 }
 0x168   : > { %v2873_v53 = vpop.f32.mrb[8].mxu1 }
 0x169   : > { %v1052_v5 = vpop.f32.mrb[9].mxu1 }
 0x16c   : > { %v2876_v15 = vpop.f32.mrb[10].mxu1 }
 0x16d   : > { %v1062_v57 = vpop.f32.mrb[11].mxu1 }
 0x170   : > { %v2879_v62 = vpop.f32.mrb[12].mxu1 }
 0x171   : > { %v4245_v43 = vpop.f32.mrb[13].mxu1 }
 0x174   : > { %v4247_v44 = vpop.f32.mrb[14].mxu1 }
 0x175   : > { %v4249_v0 = vpop.f32.mrb[15].mxu1 }
 0x179   : > { %v3021_v47 = vpop.f32.mrb[0].mxu0 }
 0x17a   : > { %v3155_v48 = vadd.f32 %v3021_v47, %v2861_v1  ;;  %v1897_v63 = vpop.f32.mrb[1].mxu0 }
 0x17b   : > { %v3156_v9 = vadd.f32 %v1897_v63, %v1012_v2 }
 0x17c   : > { %v2000_v13 = vadd.f32 %v3155_v48, %v4254_v50 }
 0x17d   : > { %v1999_v17 = vadd.f32 %v3156_v9, %v4254_v50  ;;  %v3024_v56 = vpop.f32.mrb[2].mxu0 }
 0x17e   : > { %v3157_v30 = vadd.f32 %v3024_v56, %v2864_v10  ;;  %v1907_v29 = vpop.f32.mrb[3].mxu0  ;;  %v2016_v21 = vmax.f32 %v2000_v13, 0.0 }
 0x17f   : > { %v2015_v38 = vmax.f32 %v1999_v17, 0.0  ;;  %v3158_v20 = vadd.f32 %v1907_v29, %v1022_v11 }
 0x180   : > { %v2002_v28 = vadd.f32 %v3157_v30, %v4254_v50 }
 0x181   : > { %v2001_v49 = vadd.f32 %v3158_v20, %v4254_v50  ;;  %v3027_v24 = vpop.f32.mrb[4].mxu0  ;;  %3051 = vmatprep.mubr.msk.f32.mxu1 %vm343_vm1, %v2015_v38 }
 0x182   : > { %v3159_v31 = vadd.f32 %v3027_v24, %v2867_v18  ;;  %v1917_v54 = vpop.f32.mrb[5].mxu0  ;;  %3052 = vmatmul.mubr.msk.f32.vlgmr.msra.gmra.mrb[16].mxu1 %vm343_vm1, %v2016_v21  ;;  %v2018_v59 = vmax.f32 %v2002_v28, 0.0 }
 0x183   : > { %v2017_v3 = vmax.f32 %v2001_v49, 0.0  ;;  %v3160_v40 = vadd.f32 %v1917_v54, %v1032_v19 }
 0x184   : > { %v2004_v41 = vadd.f32 %v3159_v31, %v4254_v50 }
 0x185   : > { %v2003_v8 = vadd.f32 %v3160_v40, %v4254_v50  ;;  %v3030_v16 = vpop.f32.mrb[6].mxu0  ;;  %3054 = vmatprep.mubr.msk.f32.mxu1 %vm343_vm1, %v2017_v3 }
 0x186   : > { %v3161_v37 = vadd.f32 %v3030_v16, %v2870_v33  ;;  %v1927_v39 = vpop.f32.mrb[7].mxu0  ;;  %3055 = vmatmul.mubr.msk.f32.gmra.mrb[18].mxu1 %vm343_vm1, %v2018_v59  ;;  %v2020_v32 = vmax.f32 %v2004_v41, 0.0 }
 0x187   : > { %v2019_v22 = vmax.f32 %v2003_v8, 0.0  ;;  %v3162_v26 = vadd.f32 %v1927_v39, %v1042_v34 }
 0x188   : > { %v2006_v36 = vadd.f32 %v3161_v37, %v4254_v50 }
 0x189   : > { %v2005_v45 = vadd.f32 %v3162_v26, %v4254_v50  ;;  %v3033_v46 = vpop.f32.mrb[8].mxu0  ;;  %3057 = vmatprep.mubr.msk.f32.mxu1 %vm343_vm1, %v2019_v22  ;;  %v4389_v22 = vld [vmem:[#allocation6_spill] sm:$0xff] }
 0x18a   : > { %v3163_v51 = vadd.f32 %v3033_v46, %v2873_v53  ;;  %v1937_v52 = vpop.f32.mrb[9].mxu0  ;;  %3058 = vmatmul.mubr.msk.f32.gmra.mrb[20].mxu1 %vm343_vm1, %v2020_v32  ;;  %v2022_v10 = vmax.f32 %v2006_v36, 0.0 }
 0x18b   : > { %v2021_v1 = vmax.f32 %v2005_v45, 0.0  ;;  %v3164_v2 = vadd.f32 %v1937_v52, %v1052_v5 }
 0x18c   : > { %v2008_v11 = vadd.f32 %v3163_v51, %v4254_v50 }
 0x18d   : > { %v2007_v18 = vadd.f32 %v3164_v2, %v4254_v50  ;;  %v3036_v19 = vpop.f32.mrb[10].mxu0  ;;  %3060 = vmatprep.mubr.msk.f32.mxu1 %vm343_vm1, %v2021_v1 }
 0x18e   : > { %v3165_v33 = vadd.f32 %v3036_v19, %v2876_v15  ;;  %v1947_v34 = vpop.f32.mrb[11].mxu0  ;;  %3061 = vmatmul.mubr.msk.f32.gmra.mrb[22].mxu1 %vm343_vm1, %v2022_v10  ;;  %v2024_v53 = vmax.f32 %v2008_v11, 0.0 }
 0x18f   : > { %v2023_v47 = vmax.f32 %v2007_v18, 0.0  ;;  %v3166_v48 = vadd.f32 %v1947_v34, %v1062_v57 }
 0x190   : > { %v2010_v63 = vadd.f32 %v3165_v33, %v4254_v50 }
 0x191   : > { %v2009_v9 = vadd.f32 %v3166_v48, %v4254_v50  ;;  %v3039_v5 = vpop.f32.mrb[12].mxu0  ;;  %3063 = vmatprep.mubr.msk.f32.mxu1 %vm343_vm1, %v2023_v47 }
 0x192   : > { %v3167_v13 = vadd.f32 %v3039_v5, %v2879_v62  ;;  %v1957_v17 = vpop.f32.mrb[13].mxu0  ;;  %3064 = vmatmul.mubr.msk.f32.gmra.mrb[24].mxu1 %vm343_vm1, %v2024_v53  ;;  %v2026_v30 = vmax.f32 %v2010_v63, 0.0 }
 0x193   : > { %v2025_v56 = vmax.f32 %v2009_v9, 0.0  ;;  %v3168_v15 = vadd.f32 %v1957_v17, %v4245_v43 }
 0x194   : > { %v2012_v29 = vadd.f32 %v3167_v13, %v4254_v50 }
 0x195   : > { %v2011_v57 = vadd.f32 %v3168_v15, %v4254_v50  ;;  %v3042_v38 = vpop.f32.mrb[14].mxu0  ;;  %3066 = vmatprep.mubr.msk.f32.mxu1 %vm343_vm1, %v2025_v56 }
 0x196   : > { %v3169_v20 = vadd.f32 %v3042_v38, %v4247_v44  ;;  %v1967_v21 = vpop.f32.mrb[15].mxu0  ;;  %3067 = vmatmul.mubr.msk.f32.gmra.mrb[26].mxu1 %vm343_vm1, %v2026_v30  ;;  %v2028_v49 = vmax.f32 %v2012_v29, 0.0  ;;  %v2533_v44 = vld [vmem:[%s4376_s4] ss:$0 sm:$0xff] }
 0x197   : > { %v2027_v62 = vmax.f32 %v2011_v57, 0.0  ;;  %v3170_v28 = vadd.f32 %v1967_v21, %v4249_v0 }
 0x198   : > { %v2014_v24 = vadd.f32 %v3169_v20, %v4254_v50 }
 0x199   : > { %v2013_v43 = vadd.f32 %v3170_v28, %v4254_v50  ;;  %3069 = vmatprep.mubr.msk.f32.mxu1 %vm343_vm1, %v2027_v62  ;;  %v4388_v50 = vld [vmem:[#allocation5_spill] sm:$0xff] }
 0x19a   : > { %3070 = vmatmul.mubr.msk.f32.gmra.mrb[28].mxu1 %vm343_vm1, %v2028_v49  ;;  %v2030_v54 = vmax.f32 %v2014_v24, 0.0 }
 0x19b   : > { %v2029_v31 = vmax.f32 %v2013_v43, 0.0 }
 0x19d   : > { %3072 = vmatprep.mubr.msk.f32.mxu1 %vm343_vm1, %v2029_v31 }
 0x19e   : > { %3073 = vmatmul.mubr.msk.f32.gmra.mrb[30].mxu1 %vm343_vm1, %v2030_v54 }
 0x255   : > { %v3053_v0 = vpop.f32.mrb[16].mxu1 }
 0x256   : > { %v2156_v3 = vpop.f32.mrb[17].mxu1  ;;  %v2162_v59 = vadd.f32 %v3053_v0, %v2533_v44 }
 0x257   : > { %v2157_v40 = vadd.f32 %v2533_v44, %v2156_v3 }
 0x258   : > { %v2236_v26 = vadd.f32 %v2162_v59, %v4389_v22 }
 0x259   : > { %v3056_v41 = vpop.f32.mrb[18].mxu1  ;;  %v2235_v8 = vadd.f32 %v2157_v40, %v4388_v50 }
 0x25a   : > { %v2166_v16 = vpop.f32.mrb[19].mxu1  ;;  %v2172_v36 = vadd.f32 %v3056_v41, %v2533_v44 }
 0x25b   : > { %2251 = vxpose.xlu0.b32.start [1/16] (narrow) %v2235_v8, 32  ;;  %v2167_v37 = vadd.f32 %v2533_v44, %v2166_v16 }
 0x25c   : > { %v2238_v2 = vadd.f32 %v2172_v36, %v3702_v58 }
 0x25d   : > { %v3059_v39 = vpop.f32.mrb[20].mxu1  ;;  %v2237_v46 = vadd.f32 %v2167_v37, %v3691_v55 }
 0x25e   : > { %v2176_v32 = vpop.f32.mrb[21].mxu1  ;;  %v2182_v11 = vadd.f32 %v3059_v39, %v2533_v44 }
 0x25f   : > { %2252 = vxpose.xlu0.b32.cont [2/16] (narrow) %v2236_v26, 32  ;;  %v2177_v52 = vadd.f32 %v2533_v44, %v2176_v32 }
 0x260   : > { %v2240_v48 = vadd.f32 %v2182_v11, %v3732_v4 }
 0x261   : > { %v3062_v45 = vpop.f32.mrb[22].mxu1  ;;  %v2239_v19 = vadd.f32 %v2177_v52, %v3706_v60 }
 0x262   : > { %v2186_v51 = vpop.f32.mrb[23].mxu1  ;;  %v2192_v55 = vadd.f32 %v3062_v45, %v2533_v44 }
 0x263   : > { %2253 = vxpose.xlu0.b32.cont [3/16] (narrow) %v2237_v46, 32  ;;  %v2187_v34 = vadd.f32 %v2533_v44, %v2186_v51 }
 0x264   : > { %v2242_v13 = vadd.f32 %v2192_v55, %v3760_v12 }
 0x265   : > { %v3065_v1 = vpop.f32.mrb[24].mxu1  ;;  %v2241_v9 = vadd.f32 %v2187_v34, %v3736_v6 }
 0x266   : > { %v2196_v10 = vpop.f32.mrb[25].mxu1  ;;  %v2202_v17 = vadd.f32 %v3065_v1, %v2533_v44 }
 0x267   : > { %2254 = vxpose.xlu0.b32.cont [4/16] (narrow) %v2238_v2, 32  ;;  %v2197_v58 = vadd.f32 %v2533_v44, %v2196_v10 }
 0x268   : > { %v2244_v15 = vadd.f32 %v2202_v17, %v3786_v23 }
 0x269   : > { %v3068_v18 = vpop.f32.mrb[26].mxu1  ;;  %v2243_v60 = vadd.f32 %v2197_v58, %v3764_v14 }
 0x26a   : > { %v2206_v33 = vpop.f32.mrb[27].mxu1  ;;  %v2212_v4 = vadd.f32 %v3068_v18, %v2533_v44 }
 0x26b   : > { %2255 = vxpose.xlu0.b32.cont [5/16] (narrow) %v2239_v19, 32  ;;  %v2207_v56 = vadd.f32 %v2533_v44, %v2206_v33 }
 0x26c   : > { %v2246_v29 = vadd.f32 %v2212_v4, %v3812_v35 }
 0x26d   : > { %v3071_v47 = vpop.f32.mrb[28].mxu1  ;;  %v2245_v30 = vadd.f32 %v2207_v56, %v3790_v25 }
 0x26e   : > { %v2216_v53 = vpop.f32.mrb[29].mxu1  ;;  %v2222_v57 = vadd.f32 %v3071_v47, %v2533_v44 }
 0x26f   : > { %2256 = vxpose.xlu0.b32.cont [6/16] (narrow) %v2240_v48, 32  ;;  %v2217_v6 = vadd.f32 %v2533_v44, %v2216_v53 }
 0x270   : > { %v2248_v38 = vadd.f32 %v2222_v57, %v3843_v61 }
 0x271   : > { %v3074_v63 = vpop.f32.mrb[30].mxu1  ;;  %v2247_v12 = vadd.f32 %v2217_v6, %v3820_v42 }
 0x272   : > { %v2226_v5 = vpop.f32.mrb[31].mxu1  ;;  %v2232_v23 = vadd.f32 %v3074_v63, %v2533_v44 }
 0x273   : > { %2257 = vxpose.xlu0.b32.cont [7/16] (narrow) %v2241_v9, 32  ;;  %v2227_v14 = vadd.f32 %v2533_v44, %v2226_v5 }
 0x274   : > { %v2250_v25 = vadd.f32 %v2232_v23, %v3870_v27 }
 0x275   : > { %v2249_v20 = vadd.f32 %v2227_v14, %v3850_v7 }
 0x277   : > { %2258 = vxpose.xlu0.b32.cont [8/16] (narrow) %v2242_v13, 32 }
 0x27b   : > { %2259 = vxpose.xlu0.b32.cont [9/16] (narrow) %v2243_v60, 32 }
 0x27f   : > { %2260 = vxpose.xlu0.b32.cont [10/16] (narrow) %v2244_v15, 32 }
 0x283   : > { %2261 = vxpose.xlu0.b32.cont [11/16] (narrow) %v2245_v30, 32 }
 0x287   : > { %2262 = vxpose.xlu0.b32.cont [12/16] (narrow) %v2246_v29, 32 }
 0x28b   : > { %2263 = vxpose.xlu0.b32.cont [13/16] (narrow) %v2247_v12, 32 }
 0x28f   : > { %2264 = vxpose.xlu0.b32.cont [14/16] (narrow) %v2248_v38, 32 }
 0x293   : > { %2265 = vxpose.xlu0.b32.cont [15/16] (narrow) %v2249_v20, 32 }
 0x297   : > { %2266 = vxpose.xlu0.b32.end [16/16] (narrow) %v2250_v25, 32 }
 0x2db   : > { %v2267_v35 = vpop.trf.xlu0 }
 0x2dc   : > { %2283 = vst [vmem:[%s231_s12] sm:$0xff] %v2267_v35 }
 0x2df   : > { %v2268_v42 = vpop.trf.xlu0 }
 0x2e0   : > { %2284 = vst [vmem:[%s231_s12 + $0x8] sm:$0xff] %v2268_v42 }
 0x2e3   : > { %v2269_v61 = vpop.trf.xlu0 }
 0x2e4   : > { %2285 = vst [vmem:[%s231_s12 + $0x10] sm:$0xff] %v2269_v61 }
 0x2e7   : > { %v2270_v7 = vpop.trf.xlu0 }
 0x2e8   : > { %2286 = vst [vmem:[%s231_s12 + $0x18] sm:$0xff] %v2270_v7 }
 0x2e9   : > { %3371 = shalt.err (!%p3368_p6)
}
 0x2ea   : > { %s3372_s8 = scalar_lea.hbm %s4318_s17, 512  ;;  %s3376_s30 = scalar_lea.hbm %s4377_s5, 2048 }
 0x2eb   : > { %p3373_p7 = scmp.ne.s32.totalorder %s4318_s17, %s3372_s8  ;;  %p3377_p11 = scmp.lt.u32.totalorder %s4318_s17, %s4377_s5 }
 0x2ec   : > { %p3378_p12 = scmp.lt.u32.totalorder %s3376_s30, %s3372_s8  ;;  %p3380_p0 = scmp.lt.u32.totalorder %s3372_s8, %s4318_s17 }
 0x2ed   : > { %p3374_p9 = pnand %p3373_p7, %p3539_p3 }
 0x2ee   : > { %p3379_p13 = por %p3378_p12, %p3377_p11 }
 0x2ef   : > { %p3375_p10 = pneg %p3374_p9 }
 0x2f0   : > { %p3381_p1 = por %p3380_p0, %p3379_p13 }
 0x2f2   : > { %p3382_p2 = pnand %p3381_p1, %p3375_p10 }
 0x2f4   : > { %3385 = shalt.err (!%p3382_p2)
}
 0x2f5   : > { %s3455_s15 = smov 128   ;;  %s3456_s21 = smov 256  }
 0x2f6   : > { %s3457_s26 = smov 8  }
 0x2f7   : > { %3284 = dma.vmem_to_hbm [thread:$0]  (%p3539_p3), %s4313_s9, 512, %s4318_s17, %s4320_s22, %s3455_s15, %s3456_s21, %s3457_s26  }
 0x2f8 PF: > { %p3290_p4 = scmp.ge.s32.totalorder %s3452_s25, 2  ;;  %s2317_s16 = sand.u32 1, %s3424_s18  }
 0x2f9   : > { %s2318_s10 = scalar_lea.sflag [#allocation3], %s2317_s16 }
 0x2fa   : > { %p3287_p5 = pnand %p3290_p4, %p3548_p8 }
 0x2fc   : > { %3419 = dma.done.wait (!%p3287_p5), %s2318_s10, 512  }
 0x2fd   : > { %3421 = vsyncadd (!%p3287_p5), %s2318_s10, 4294966784  ;;  %s18_s25 = sadd.s32 1, %s3452_s25   ;;  %s4390_s18 = smov %s3428_s19 }
 0x2fe   : > { %p15_p6 = scmp.ge.s32.totalorder %s18_s25, 6   ;;  %s4391_s19 = smov %s3432_s20 }
 0x2ff   : > { %s4392_s20 = smov %s3557_s11  ;;  %s4393_s21 = smov %s3444_s23 }
 0x300   : > { %s4394_s22 = smov %s3448_s24  ;;  %s4395_s23 = smov %s4398_s28 }
 0x301   : > { %s4396_s24 = smov %s4402_s29  ;;  %17 = sbr.rel (!%p15_p6) target bundleno = 5 (0x5), region = 76 }
 0x308   :  { %2323 = vsyncpa [#allocation3], 1 }
 0x309   :  { %2325 = vsyncpa [#allocation3 + $0x1], 1 }

</bundles_post_ra>
